<compile_context>
chip_gen: v5e
topology: v5e:2x2
jax: 0.10.0
libtpu: 0.0.40
codegen_flags: <defaults>
</compile_context>

<pallas_src>
import math

import jax
import jax.numpy as jnp
from jax.experimental import pallas as pl
from jax.experimental.pallas import tpu as pltpu  # noqa: F401  (no grid/compiler params needed at this size)

# ----------------------------- config (small) -------------------------------
BATCH = 2
SEQ_LEN = 16       # embed_dim of the channel MultiheadAttention, must be % 4
PRED_LEN = 8
ENC_IN = 8         # number of channels (attention "sequence" length)
D_MODEL = 32
CYCLE_LEN = 24
NUM_HEADS = 4
HEAD_DIM = SEQ_LEN // NUM_HEADS
assert SEQ_LEN % NUM_HEADS == 0

BC = BATCH * ENC_IN                 # rows of the flattened activations (16)
HBC = NUM_HEADS * BC                # stacked-head rows for attention (64)
WPAD = max(2 * SEQ_LEN, D_MODEL)    # lane width of the packed slab (=32)

# row offsets inside the single packed parameter slab (all multiples of 8)
_R_WQ = 0
_R_WK = _R_WQ + SEQ_LEN
_R_WV = _R_WK + SEQ_LEN
_R_WAO = _R_WV + SEQ_LEN
_R_WP = _R_WAO + SEQ_LEN
_R_W1 = _R_WP + SEQ_LEN
_R_W2 = _R_W1 + D_MODEL
_R_WOUT = _R_W2 + D_MODEL
_R_HM = _R_WOUT + D_MODEL           # head-column selector mask  (HBC, S)
_R_BM = _R_HM + HBC                 # block-diagonal batch mask  (HBC, BC)
_R_BQ = _R_BM + HBC                 # biases, pre-broadcast to BC rows
_R_BK = _R_BQ + BC
_R_BV = _R_BK + BC
_R_BAO = _R_BV + BC
_R_BP = _R_BAO + BC
_R_B1 = _R_BP + BC
_R_B2 = _R_B1 + BC
_R_BOUT = _R_B2 + BC
_R_END = _R_BOUT + BC


def _gelu_exact(x):
    # nn.GELU() default = exact erf-based GELU
    return 0.5 * x * (1.0 + jax.lax.erf(x * (1.0 / math.sqrt(2.0))))


# ------------------------------- the kernel ---------------------------------
def tqnet_kernel(xq_ref, w_ref, out_ref):
    S, C, B, H = SEQ_LEN, ENC_IN, BATCH, NUM_HEADS
    D, P = D_MODEL, PRED_LEN
    f32 = jnp.float32

    x = xq_ref[0:BC, 0:S]              # (B*C, S) raw series, one (batch, chan) per row
    qin = xq_ref[BC:2 * BC, 0:S]       # (B*C, S) mixed temporal query

    # ---- RevIN normalize (mean/var over time; torch.var is unbiased) ----
    mean = jnp.mean(x, axis=-1, keepdims=True)                              # (B*C, 1)
    var = jnp.sum((x - mean) ** 2, axis=-1, keepdims=True) * (1.0 / (S - 1)) + 1e-5
    inv_std = jax.lax.rsqrt(var)                                            # EUP rsqrt
    std = var * inv_std                                                     # sqrt(var), no divide
    xn = (x - mean) * inv_std                                               # (B*C, S)

    # ---- packed parameters (single slab; static, aligned slices) ----
    wqT = w_ref[_R_WQ:_R_WQ + S, 0:S]          # scale 1/sqrt(dh) folded in at pack time
    wkT = w_ref[_R_WK:_R_WK + S, 0:S]
    wvT = w_ref[_R_WV:_R_WV + S, 0:S]
    waoT = w_ref[_R_WAO:_R_WAO + S, 0:S]
    wpT = w_ref[_R_WP:_R_WP + S, 0:D]
    w1T = w_ref[_R_W1:_R_W1 + D, 0:D]
    w2T = w_ref[_R_W2:_R_W2 + D, 0:D]
    woutT = w_ref[_R_WOUT:_R_WOUT + D, 0:P]
    hmask = w_ref[_R_HM:_R_HM + HBC, 0:S]      # (H*B*C, S)  head-column selector
    bmask = w_ref[_R_BM:_R_BM + HBC, 0:BC]     # (H*B*C, B*C) same-batch selector
    bq = w_ref[_R_BQ:_R_BQ + BC, 0:S]          # biases pre-broadcast to BC rows
    bk = w_ref[_R_BK:_R_BK + BC, 0:S]
    bv = w_ref[_R_BV:_R_BV + BC, 0:S]
    bao = w_ref[_R_BAO:_R_BAO + BC, 0:S]
    bp = w_ref[_R_BP:_R_BP + BC, 0:D]
    b1 = w_ref[_R_B1:_R_B1 + BC, 0:D]
    b2 = w_ref[_R_B2:_R_B2 + BC, 0:D]
    bout = w_ref[_R_BOUT:_R_BOUT + BC, 0:P]

    # ---- channel MultiheadAttention: query = temporal query, key/value = xn ----
    # Separate Q / K / V matmuls (no lane-offset slice / relayout).
    q = jnp.dot(qin, wqT, preferred_element_type=f32) + bq                  # (B*C, S), pre-scaled
    k = jnp.dot(xn, wkT, preferred_element_type=f32) + bk                   # (B*C, S)
    v = jnp.dot(xn, wvT, preferred_element_type=f32) + bv                   # (B*C, S)

    # Stack every (head, batch, channel) query as its own row (head-major).
    # Masking q to head-h columns makes the full-S contraction equal the
    # per-head dh contraction exactly; the batch mask zeroes cross-batch
    # probabilities so one big matmul covers both batches.
    q_exp = jnp.concatenate([q] * H, axis=0) * hmask                        # (H*B*C, S)
    s_all = jax.lax.dot_general(q_exp, k, (((1,), (1,)), ((), ())),
                                preferred_element_type=f32)                 # (H*B*C, B*C)
    s_all = s_all - jnp.max(s_all, axis=-1, keepdims=True)
    e = jnp.exp(s_all) * bmask
    denom = jnp.sum(e, axis=-1, keepdims=True)
    p_all = e * pl.reciprocal(denom, approx=False)                          # exact softmax
    o_all = jnp.dot(p_all, v, preferred_element_type=f32) * hmask           # (H*B*C, S)
    attn = (o_all[0 * BC:1 * BC, :] + o_all[1 * BC:2 * BC, :] +
            o_all[2 * BC:3 * BC, :] + o_all[3 * BC:4 * BC, :])              # (B*C, S)
    chan = jnp.dot(attn, waoT, preferred_element_type=f32) + bao            # (B*C, S)

    # ---- input_proj -> 2-layer GELU MLP -> output_proj ----
    inp = jnp.dot(xn + chan, wpT, preferred_element_type=f32) + bp          # (B*C, D)
    h1 = _gelu_exact(jnp.dot(inp, w1T, preferred_element_type=f32) + b1)
    h2 = _gelu_exact(jnp.dot(h1, w2T, preferred_element_type=f32) + b2)
    out = jnp.dot(h2 + inp, woutT, preferred_element_type=f32) + bout       # (B*C, P)

    # ---- RevIN de-normalize; (C,P)->(P,C) transpose left to the wrapper ----
    out_ref[...] = out * std + mean                                         # (B*C, P)


# --------------------------- one-time parameter packing -----------------------
def pack_params(p):
    """Build the constant packed parameter slab ONCE (not per forward call)."""
    S, C, D, B, H = SEQ_LEN, ENC_IN, D_MODEL, BATCH, NUM_HEADS
    scale = 1.0 / math.sqrt(HEAD_DIM)

    def lane_pad(a):
        a = jnp.asarray(a, jnp.float32)
        return jnp.pad(a, ((0, 0), (0, WPAD - a.shape[1])))

    def bias_block(b, s=1.0):
        b = jnp.asarray(b, jnp.float32).reshape(1, -1) * s
        return lane_pad(jnp.broadcast_to(b, (BC, b.shape[1])))

    # head selector: row r -> head r // (B*C); column s belongs to head s // HEAD_DIM
    r = jnp.arange(HBC)
    hmask = (jnp.arange(S)[None, :] // HEAD_DIM == (r // BC)[:, None]).astype(jnp.float32)
    # batch selector: row r -> batch (r % BC) // C; column j -> batch j // C
    bmask = ((jnp.arange(BC)[None, :] // C) == ((r % BC) // C)[:, None]).astype(jnp.float32)

    w_pack = jnp.concatenate([
        lane_pad(p["wq"].T * scale),       # score scale folded into Wq
        lane_pad(p["wk"].T),
        lane_pad(p["wv"].T),
        lane_pad(p["wo_a"].T),
        lane_pad(p["wp"].T),
        lane_pad(p["w1"].T),
        lane_pad(p["w2"].T),
        lane_pad(p["wout"].T),
        lane_pad(hmask),
        lane_pad(bmask),
        bias_block(p["bq"], scale),        # score scale folded into bq
        bias_block(p["bk"]),
        bias_block(p["bv"]),
        bias_block(p["bo_a"]),
        bias_block(p["bp"]),
        bias_block(p["b1"]),
        bias_block(p["b2"]),
        bias_block(p["bout"]),
    ], axis=0)
    assert w_pack.shape == (_R_END, WPAD), w_pack.shape
    return w_pack


# ------------------------------- wrapper -------------------------------------
@jax.jit
def tqnet_forward(x, cycle_index, week_cycle_index, tq, tqw, alpha, beta, w_pack):
    """x: (B, seq_len, enc_in) f32; indices: (B,) int32.  Returns (B, pred_len, enc_in)."""
    B, S, C = x.shape

    # glue: temporal-query gather + alpha/beta mix (data-dependent indexing; kept in XLA)
    ar = jnp.arange(S)
    gi = (cycle_index[:, None] + ar[None, :]) % CYCLE_LEN
    wgi = (week_cycle_index[:, None] + ar[None, :]) % CYCLE_LEN
    q_mixed = alpha * tq[gi] + beta * tqw[wgi]                              # (B, S, C)
    q_flat = jnp.transpose(q_mixed, (0, 2, 1)).reshape(B * C, S)            # (B*C, S)
    x_flat = jnp.transpose(x, (0, 2, 1)).reshape(B * C, S)                  # (B*C, S)
    xq_pack = jnp.concatenate([x_flat, q_flat], axis=0)                     # (2*B*C, S)

    out_flat = pl.pallas_call(
        tqnet_kernel,
        out_shape=jax.ShapeDtypeStruct((B * C, PRED_LEN), jnp.float32),
    )(xq_pack, w_pack)

    # tiny (C,P)->(P,C) per-batch transpose done by XLA outside the kernel
    return out_flat.reshape(B, C, PRED_LEN).transpose(0, 2, 1)              # (B, pred_len, enc_in)


# --------------------------- pure-JAX reference -------------------------------
def reference_forward(x, cycle_index, week_cycle_index, p):
    B, S, C = x.shape
    mean = jnp.mean(x, axis=1, keepdims=True)
    var = jnp.var(x, axis=1, keepdims=True, ddof=1) + 1e-5
    xn = (x - mean) / jnp.sqrt(var)
    x_in = jnp.transpose(xn, (0, 2, 1))                                     # (B, C, S)

    ar = jnp.arange(S)
    gi = (cycle_index[:, None] + ar[None, :]) % CYCLE_LEN
    wgi = (week_cycle_index[:, None] + ar[None, :]) % CYCLE_LEN
    qinp = p["alpha"] * p["tq"][gi] + p["beta"] * p["tqw"][wgi]
    qinp = jnp.transpose(qinp, (0, 2, 1))                                   # (B, C, S)

    q = qinp @ p["wq"].T + p["bq"]
    k = x_in @ p["wk"].T + p["bk"]
    v = x_in @ p["wv"].T + p["bv"]
    dh = S // NUM_HEADS

    def split(t):
        return t.reshape(B, C, NUM_HEADS, dh).transpose(0, 2, 1, 3)

    qh, kh, vh = split(q), split(k), split(v)
    s = jnp.einsum("bhqd,bhkd->bhqk", qh, kh) / math.sqrt(dh)
    a = jax.nn.softmax(s, axis=-1)
    o = jnp.einsum("bhqk,bhkd->bhqd", a, vh).transpose(0, 2, 1, 3).reshape(B, C, S)
    chan = o @ p["wo_a"].T + p["bo_a"]

    inp = (x_in + chan) @ p["wp"].T + p["bp"]
    h1 = jax.nn.gelu(inp @ p["w1"].T + p["b1"], approximate=False)
    h2 = jax.nn.gelu(h1 @ p["w2"].T + p["b2"], approximate=False)
    out = (h2 + inp) @ p["wout"].T + p["bout"]                              # (B, C, P)
    out = jnp.transpose(out, (0, 2, 1))                                     # (B, P, C)
    return out * jnp.sqrt(var) + mean


# ---------------------------------- main --------------------------------------
def init_params(key):
    ks = jax.random.split(key, 20)
    n = lambda k, shape, s=0.1: (s * jax.random.normal(k, shape)).astype(jnp.float32)
    S, C, D, P = SEQ_LEN, ENC_IN, D_MODEL, PRED_LEN
    return {
        # temporal queries (zeros in torch __init__; randomized here to exercise the path)
        "tq": n(ks[0], (CYCLE_LEN, C)), "tqw": n(ks[1], (CYCLE_LEN, C)),
        "alpha": jnp.float32(0.5), "beta": jnp.float32(0.5),
        # MultiheadAttention(embed_dim=S, num_heads=4): in_proj split + out_proj
        "wq": n(ks[2], (S, S)), "bq": n(ks[3], (S,), 0.02),
        "wk": n(ks[4], (S, S)), "bk": n(ks[5], (S,), 0.02),
        "wv": n(ks[6], (S, S)), "bv": n(ks[7], (S,), 0.02),
        "wo_a": n(ks[8], (S, S)), "bo_a": n(ks[9], (S,), 0.02),
        # input_proj: Linear(S, D)
        "wp": n(ks[10], (D, S)), "bp": n(ks[11], (D,), 0.02),
        # model: Linear(D, D) -> GELU -> Linear(D, D) -> GELU
        "w1": n(ks[12], (D, D)), "b1": n(ks[13], (D,), 0.02),
        "w2": n(ks[14], (D, D)), "b2": n(ks[15], (D,), 0.02),
        # output_proj: Dropout (eval: identity) -> Linear(D, P)
        "wout": n(ks[16], (P, D)), "bout": n(ks[17], (P,), 0.02),
    }


if __name__ == "__main__":
    key = jax.random.PRNGKey(0)
    kx, kc, kw, kp = jax.random.split(key, 4)

    x = jax.random.normal(kx, (BATCH, SEQ_LEN, ENC_IN), dtype=jnp.float32)
    cycle_index = jax.random.randint(kc, (BATCH,), 0, CYCLE_LEN, dtype=jnp.int32)
    week_cycle_index = jax.random.randint(kw, (BATCH,), 0, CYCLE_LEN, dtype=jnp.int32)
    params = init_params(kp)

    # constant parameter slab built ONCE, outside the forward path
    w_pack = jax.block_until_ready(pack_params(params))

    out = tqnet_forward(x, cycle_index, week_cycle_index,
                        params["tq"], params["tqw"], params["alpha"], params["beta"],
                        w_pack)
    out = jax.block_until_ready(out)

    ref = reference_forward(x, cycle_index, week_cycle_index, params)
    ref = jax.block_until_ready(ref)

    assert out.shape == (BATCH, PRED_LEN, ENC_IN), out.shape
    if not jnp.allclose(out, ref, atol=1e-4, rtol=1e-4):
        raise AssertionError("Pallas kernel output mismatch vs pure-JAX reference")

    print("KERNEL_OK")
</pallas_src>

<mosaic_0001>
module attributes {stable_mosaic.version = 11 : i64} {
  func.func @tqnet_kernel(%arg0: memref<32x16xf32, #tpu.memory_space<vmem>>, %arg1: memref<432x32xf32, #tpu.memory_space<vmem>>, %arg2: memref<16x8xf32, #tpu.memory_space<vmem>>) attributes {dimension_semantics = [], scalar_prefetch = 0 : i64, scratch_operands = 0 : i64, tpu.core_type = #tpu.core_type<tc>} {
    %c0 = arith.constant 0 : index
    %c0_0 = arith.constant 0 : index
    %0 = vector.load %arg0[%c0, %c0_0] : memref<32x16xf32, #tpu.memory_space<vmem>>, vector<16x16xf32>
    %c16 = arith.constant 16 : index
    %c0_1 = arith.constant 0 : index
    %1 = vector.load %arg0[%c16, %c0_1] : memref<32x16xf32, #tpu.memory_space<vmem>>, vector<16x16xf32>
    %cst = arith.constant dense<0.000000e+00> : vector<16xf32>
    %2 = vector.multi_reduction <add>, %0, %cst [1] : vector<16x16xf32> to vector<16xf32>
    %3 = vector.shape_cast %2 : vector<16xf32> to vector<16x1xf32>
    %cst_2 = arith.constant 1.600000e+01 : f32
    %4 = vector.broadcast %cst_2 : f32 to vector<16x1xf32>
    %5 = arith.divf %3, %4 : vector<16x1xf32>
    %6 = vector.broadcast %5 : vector<16x1xf32> to vector<16x16xf32>
    %7 = arith.subf %0, %6 : vector<16x16xf32>
    %8 = arith.mulf %7, %7 : vector<16x16xf32>
    %cst_3 = arith.constant dense<0.000000e+00> : vector<16xf32>
    %9 = vector.multi_reduction <add>, %8, %cst_3 [1] : vector<16x16xf32> to vector<16xf32>
    %10 = vector.shape_cast %9 : vector<16xf32> to vector<16x1xf32>
    %cst_4 = arith.constant 0.0666666701 : f32
    %11 = vector.broadcast %cst_4 : f32 to vector<16x1xf32>
    %12 = arith.mulf %10, %11 : vector<16x1xf32>
    %cst_5 = arith.constant 9.99999974E-6 : f32
    %13 = vector.broadcast %cst_5 : f32 to vector<16x1xf32>
    %14 = arith.addf %12, %13 : vector<16x1xf32>
    %15 = math.rsqrt %14 : vector<16x1xf32>
    %16 = arith.mulf %14, %15 : vector<16x1xf32>
    %17 = vector.broadcast %5 : vector<16x1xf32> to vector<16x16xf32>
    %18 = arith.subf %0, %17 : vector<16x16xf32>
    %19 = vector.broadcast %15 : vector<16x1xf32> to vector<16x16xf32>
    %20 = arith.mulf %18, %19 : vector<16x16xf32>
    %c0_6 = arith.constant 0 : index
    %c0_7 = arith.constant 0 : index
    %21 = vector.load %arg1[%c0_6, %c0_7] : memref<432x32xf32, #tpu.memory_space<vmem>>, vector<16x16xf32>
    %c16_8 = arith.constant 16 : index
    %c0_9 = arith.constant 0 : index
    %22 = vector.load %arg1[%c16_8, %c0_9] : memref<432x32xf32, #tpu.memory_space<vmem>>, vector<16x16xf32>
    %c32 = arith.constant 32 : index
    %c0_10 = arith.constant 0 : index
    %23 = vector.load %arg1[%c32, %c0_10] : memref<432x32xf32, #tpu.memory_space<vmem>>, vector<16x16xf32>
    %c48 = arith.constant 48 : index
    %c0_11 = arith.constant 0 : index
    %24 = vector.load %arg1[%c48, %c0_11] : memref<432x32xf32, #tpu.memory_space<vmem>>, vector<16x16xf32>
    %c64 = arith.constant 64 : index
    %c0_12 = arith.constant 0 : index
    %25 = vector.load %arg1[%c64, %c0_12] : memref<432x32xf32, #tpu.memory_space<vmem>>, vector<16x32xf32>
    %c80 = arith.constant 80 : index
    %c0_13 = arith.constant 0 : index
    %26 = vector.load %arg1[%c80, %c0_13] : memref<432x32xf32, #tpu.memory_space<vmem>>, vector<32x32xf32>
    %c112 = arith.constant 112 : index
    %c0_14 = arith.constant 0 : index
    %27 = vector.load %arg1[%c112, %c0_14] : memref<432x32xf32, #tpu.memory_space<vmem>>, vector<32x32xf32>
    %c144 = arith.constant 144 : index
    %c0_15 = arith.constant 0 : index
    %28 = vector.load %arg1[%c144, %c0_15] : memref<432x32xf32, #tpu.memory_space<vmem>>, vector<32x8xf32>
    %c176 = arith.constant 176 : index
    %c0_16 = arith.constant 0 : index
    %29 = vector.load %arg1[%c176, %c0_16] : memref<432x32xf32, #tpu.memory_space<vmem>>, vector<64x16xf32>
    %c240 = arith.constant 240 : index
    %c0_17 = arith.constant 0 : index
    %30 = vector.load %arg1[%c240, %c0_17] : memref<432x32xf32, #tpu.memory_space<vmem>>, vector<64x16xf32>
    %c304 = arith.constant 304 : index
    %c0_18 = arith.constant 0 : index
    %31 = vector.load %arg1[%c304, %c0_18] : memref<432x32xf32, #tpu.memory_space<vmem>>, vector<16x16xf32>
    %c320 = arith.constant 320 : index
    %c0_19 = arith.constant 0 : index
    %32 = vector.load %arg1[%c320, %c0_19] : memref<432x32xf32, #tpu.memory_space<vmem>>, vector<16x16xf32>
    %c336 = arith.constant 336 : index
    %c0_20 = arith.constant 0 : index
    %33 = vector.load %arg1[%c336, %c0_20] : memref<432x32xf32, #tpu.memory_space<vmem>>, vector<16x16xf32>
    %c352 = arith.constant 352 : index
    %c0_21 = arith.constant 0 : index
    %34 = vector.load %arg1[%c352, %c0_21] : memref<432x32xf32, #tpu.memory_space<vmem>>, vector<16x16xf32>
    %c368 = arith.constant 368 : index
    %c0_22 = arith.constant 0 : index
    %35 = vector.load %arg1[%c368, %c0_22] : memref<432x32xf32, #tpu.memory_space<vmem>>, vector<16x32xf32>
    %c384 = arith.constant 384 : index
    %c0_23 = arith.constant 0 : index
    %36 = vector.load %arg1[%c384, %c0_23] : memref<432x32xf32, #tpu.memory_space<vmem>>, vector<16x32xf32>
    %c400 = arith.constant 400 : index
    %c0_24 = arith.constant 0 : index
    %37 = vector.load %arg1[%c400, %c0_24] : memref<432x32xf32, #tpu.memory_space<vmem>>, vector<16x32xf32>
    %c416 = arith.constant 416 : index
    %c0_25 = arith.constant 0 : index
    %38 = vector.load %arg1[%c416, %c0_25] : memref<432x32xf32, #tpu.memory_space<vmem>>, vector<16x8xf32>
    %cst_26 = arith.constant dense<0.000000e+00> : vector<16x16xf32>
    %39 = tpu.matmul %1, %21, %cst_26 {dimension_numbers = #tpu.dot_dimension_numbers<[1], [0], [0], [1], [0, 0, 1, 1], [], []>} : vector<16x16xf32>, vector<16x16xf32>, vector<16x16xf32> -> vector<16x16xf32>
    %40 = arith.addf %39, %31 : vector<16x16xf32>
    %cst_27 = arith.constant dense<0.000000e+00> : vector<16x16xf32>
    %41 = tpu.matmul %20, %22, %cst_27 {dimension_numbers = #tpu.dot_dimension_numbers<[1], [0], [0], [1], [0, 0, 1, 1], [], []>} : vector<16x16xf32>, vector<16x16xf32>, vector<16x16xf32> -> vector<16x16xf32>
    %42 = arith.addf %41, %32 : vector<16x16xf32>
    %cst_28 = arith.constant dense<0.000000e+00> : vector<16x16xf32>
    %43 = tpu.matmul %20, %23, %cst_28 {dimension_numbers = #tpu.dot_dimension_numbers<[1], [0], [0], [1], [0, 0, 1, 1], [], []>} : vector<16x16xf32>, vector<16x16xf32>, vector<16x16xf32> -> vector<16x16xf32>
    %44 = arith.addf %43, %33 : vector<16x16xf32>
    %45 = tpu.concatenate %40, %40, %40, %40 in 0 : vector<16x16xf32>, vector<16x16xf32>, vector<16x16xf32>, vector<16x16xf32> -> vector<64x16xf32>
    %46 = arith.mulf %45, %29 : vector<64x16xf32>
    %cst_29 = arith.constant dense<0.000000e+00> : vector<64x16xf32>
    %47 = tpu.matmul %46, %42, %cst_29 {dimension_numbers = #tpu.dot_dimension_numbers<[1], [1], [0], [0], [0, 0, 1, 0], [], []>} : vector<64x16xf32>, vector<16x16xf32>, vector<64x16xf32> -> vector<64x16xf32>
    %cst_30 = arith.constant dense<0xFF800000> : vector<64xf32>
    %48 = vector.multi_reduction <maximumf>, %47, %cst_30 [1] : vector<64x16xf32> to vector<64xf32>
    %49 = vector.shape_cast %48 : vector<64xf32> to vector<64x1xf32>
    %50 = vector.broadcast %49 : vector<64x1xf32> to vector<64x16xf32>
    %51 = arith.subf %47, %50 : vector<64x16xf32>
    %52 = math.exp %51 : vector<64x16xf32>
    %53 = arith.mulf %52, %30 : vector<64x16xf32>
    %cst_31 = arith.constant dense<0.000000e+00> : vector<64xf32>
    %54 = vector.multi_reduction <add>, %53, %cst_31 [1] : vector<64x16xf32> to vector<64xf32>
    %55 = vector.shape_cast %54 : vector<64xf32> to vector<64x1xf32>
    %56 = tpu.reciprocal %55 : vector<64x1xf32> -> vector<64x1xf32>
    %57 = vector.broadcast %56 : vector<64x1xf32> to vector<64x16xf32>
    %58 = arith.mulf %53, %57 : vector<64x16xf32>
    %cst_32 = arith.constant dense<0.000000e+00> : vector<64x16xf32>
    %59 = tpu.matmul %58, %44, %cst_32 {dimension_numbers = #tpu.dot_dimension_numbers<[1], [0], [0], [1], [0, 0, 1, 1], [], []>} : vector<64x16xf32>, vector<16x16xf32>, vector<64x16xf32> -> vector<64x16xf32>
    %60 = arith.mulf %59, %29 : vector<64x16xf32>
    %61 = vector.extract_strided_slice %60 {offsets = [0, 0], sizes = [16, 16], strides = [1, 1]} : vector<64x16xf32> to vector<16x16xf32>
    %62 = vector.extract_strided_slice %60 {offsets = [16, 0], sizes = [16, 16], strides = [1, 1]} : vector<64x16xf32> to vector<16x16xf32>
    %63 = arith.addf %61, %62 : vector<16x16xf32>
    %64 = vector.extract_strided_slice %60 {offsets = [32, 0], sizes = [16, 16], strides = [1, 1]} : vector<64x16xf32> to vector<16x16xf32>
    %65 = arith.addf %63, %64 : vector<16x16xf32>
    %66 = vector.extract_strided_slice %60 {offsets = [48, 0], sizes = [16, 16], strides = [1, 1]} : vector<64x16xf32> to vector<16x16xf32>
    %67 = arith.addf %65, %66 : vector<16x16xf32>
    %cst_33 = arith.constant dense<0.000000e+00> : vector<16x16xf32>
    %68 = tpu.matmul %67, %24, %cst_33 {dimension_numbers = #tpu.dot_dimension_numbers<[1], [0], [0], [1], [0, 0, 1, 1], [], []>} : vector<16x16xf32>, vector<16x16xf32>, vector<16x16xf32> -> vector<16x16xf32>
    %69 = arith.addf %68, %34 : vector<16x16xf32>
    %70 = arith.addf %20, %69 : vector<16x16xf32>
    %cst_34 = arith.constant dense<0.000000e+00> : vector<16x32xf32>
    %71 = tpu.matmul %70, %25, %cst_34 {dimension_numbers = #tpu.dot_dimension_numbers<[1], [0], [0], [1], [0, 0, 1, 1], [], []>} : vector<16x16xf32>, vector<16x32xf32>, vector<16x32xf32> -> vector<16x32xf32>
    %72 = arith.addf %71, %35 : vector<16x32xf32>
    %cst_35 = arith.constant dense<0.000000e+00> : vector<16x32xf32>
    %73 = tpu.matmul %72, %26, %cst_35 {dimension_numbers = #tpu.dot_dimension_numbers<[1], [0], [0], [1], [0, 0, 1, 1], [], []>} : vector<16x32xf32>, vector<32x32xf32>, vector<16x32xf32> -> vector<16x32xf32>
    %74 = arith.addf %73, %36 : vector<16x32xf32>
    %cst_36 = arith.constant 5.000000e-01 : f32
    %75 = vector.broadcast %cst_36 : f32 to vector<16x32xf32>
    %76 = arith.mulf %75, %74 : vector<16x32xf32>
    %cst_37 = arith.constant 0.707106769 : f32
    %77 = vector.broadcast %cst_37 : f32 to vector<16x32xf32>
    %78 = arith.mulf %74, %77 : vector<16x32xf32>
    %79 = math.erf %78 : vector<16x32xf32>
    %cst_38 = arith.constant 1.000000e+00 : f32
    %80 = vector.broadcast %cst_38 : f32 to vector<16x32xf32>
    %81 = arith.addf %80, %79 : vector<16x32xf32>
    %82 = arith.mulf %76, %81 : vector<16x32xf32>
    %cst_39 = arith.constant dense<0.000000e+00> : vector<16x32xf32>
    %83 = tpu.matmul %82, %27, %cst_39 {dimension_numbers = #tpu.dot_dimension_numbers<[1], [0], [0], [1], [0, 0, 1, 1], [], []>} : vector<16x32xf32>, vector<32x32xf32>, vector<16x32xf32> -> vector<16x32xf32>
    %84 = arith.addf %83, %37 : vector<16x32xf32>
    %cst_40 = arith.constant 5.000000e-01 : f32
    %85 = vector.broadcast %cst_40 : f32 to vector<16x32xf32>
    %86 = arith.mulf %85, %84 : vector<16x32xf32>
    %cst_41 = arith.constant 0.707106769 : f32
    %87 = vector.broadcast %cst_41 : f32 to vector<16x32xf32>
    %88 = arith.mulf %84, %87 : vector<16x32xf32>
    %89 = math.erf %88 : vector<16x32xf32>
    %cst_42 = arith.constant 1.000000e+00 : f32
    %90 = vector.broadcast %cst_42 : f32 to vector<16x32xf32>
    %91 = arith.addf %90, %89 : vector<16x32xf32>
    %92 = arith.mulf %86, %91 : vector<16x32xf32>
    %93 = arith.addf %92, %72 : vector<16x32xf32>
    %cst_43 = arith.constant dense<0.000000e+00> : vector<16x8xf32>
    %94 = tpu.matmul %93, %28, %cst_43 {dimension_numbers = #tpu.dot_dimension_numbers<[1], [0], [0], [1], [0, 0, 1, 1], [], []>} : vector<16x32xf32>, vector<32x8xf32>, vector<16x8xf32> -> vector<16x8xf32>
    %95 = arith.addf %94, %38 : vector<16x8xf32>
    %96 = vector.broadcast %16 : vector<16x1xf32> to vector<16x8xf32>
    %97 = arith.mulf %95, %96 : vector<16x8xf32>
    %98 = vector.broadcast %5 : vector<16x1xf32> to vector<16x8xf32>
    %99 = arith.addf %97, %98 : vector<16x8xf32>
    %c0_44 = arith.constant 0 : index
    %c0_45 = arith.constant 0 : index
    %100 = vector.load %arg2[%c0_44, %c0_45] : memref<16x8xf32, #tpu.memory_space<vmem>>, vector<16x8xf32>
    tpu.vector_store %arg2[%c0_44, %c0_45], %99 {strides = array<i32>} : memref<16x8xf32, #tpu.memory_space<vmem>>, vector<16x8xf32>,
    return
  }
}

</mosaic_0001>

<bundles_post_ra>
// kernel: tqnet_forward.1
= control target key start
LH: loop header
LB: loop body
LE: loop exit
PB: predicated region body
PF: predicated region fallthrough
CT: control target
= control target key end

     0   :  { %vm15_vm0 = vcmask 130048   ;;  %v984_v4 = vmov 16.0   ;;  %s1370_s0 = inlined_call_operand.vmem [shape: f32[32,16], index: 0, kind: input, shape index: {}]   ;;  %s1371_s1 = inlined_call_operand.vmem [shape: f32[432,32], index: 1, kind: input, shape index: {}]   ;;  %s1372_s2 = inlined_call_operand.vmem [shape: f32[16,8], index: 2, kind: output, shape index: {}]  }
   0x1   :  { %v11_v0 = vld [vmem:[%s1370_s0] sm:$0xff]  ;;  %v12_v2 = vld [vmem:[%s1370_s0 + $0x8] sm:$0xff]  ;;  %938 = vrcp.f32 %v984_v4  ;;  %v13_v23 = vld [vmem:[%s1370_s0 + $0x10] sm:$0xff] }
   0x2   :  { %v16_v1 = vsel %vm15_vm0, %v11_v0, 0.0  ;;  %v19_v3 = vsel %vm15_vm0, %v12_v2, 0.0  ;;  %v70_v21 = vld [vmem:[%s1371_s1 + $0x8] sm:$0xff]  ;;  %v69_v22 = vld [vmem:[%s1371_s1] sm:$0xff]  ;;  %v14_v24 = vld [vmem:[%s1370_s0 + $0x18] sm:$0xff] }
   0x3   :  { %17 = vadd.xlane.f32.xlu0 %v16_v1  ;;  %143 = vmatpush.msra.mxu2 %v70_v21  ;;  %v72_v25 = vld [vmem:[%s1371_s1 + $0x18] sm:$0xff]  ;;  %v74_v26 = vld [vmem:[%s1371_s1 + $0x28] sm:$0xff]  ;;  %v71_v27 = vld [vmem:[%s1371_s1 + $0x10] sm:$0xff] }
   0x4   :  { %172 = vmatpush.msra.mxu1 %v72_v25  ;;  %v73_v28 = vld [vmem:[%s1371_s1 + $0x20] sm:$0xff]  ;;  %v110_v57 = vld [vmem:[%s1371_s1 + $0x148] sm:$0xff]  ;;  %v107_v58 = vld [vmem:[%s1371_s1 + $0x130] sm:$0xff] }
   0x5   :  { %144 = vmatpush.msra.mxu2 %v69_v22  ;;  %v109_v62 = vld [vmem:[%s1371_s1 + $0x140] sm:$0xff]  ;;  %v1071_v63 = vld [vmem:[%s1371_s1 + $0xb0] sm:$0xff] }
   0x6   :  { %899 = vmatmul.msk.f32.vlgmr.msra.gmra.mxu2 %vm15_vm0, %v13_v23  ;;  %173 = vmatpush.msra.mxu1 %v71_v27  ;;  %v1123_v21 = vld [vmem:[%s1371_s1 + $0xe0] sm:$0xff]  ;;  %v1130_v23 = vld [vmem:[%s1371_s1 + $0xe8] sm:$0xff] }
   0x7   :  { %v939_v5 = vpop.eup %938  ;;  %195 = vmatpush.msrb.mxu2 %v74_v26 }
   0x8   :  { %v23_v6 = vmul.f32 16.0, %v939_v5  ;;  %vm27_vm1 = vweird.f32 %v939_v5 }
   0x9   :  { %196 = vmatpush.msrb.mxu2 %v73_v28 }
   0xa   :  { %v24_v7 = vsub.f32 1.0, %v23_v6 }
   0xb   :  { %20 = vadd.xlane.f32.xlu0 %v19_v3 }
   0xc   :  { %v25_v8 = vmul.f32 %v939_v5, %v24_v7 }
   0xe   :  { %v26_v9 = vadd.f32 %v939_v5, %v25_v8  ;;  %900 = vmatmul.msk.f32.gmra.mxu2 %vm15_vm0, %v14_v24 }
  0x10   :  { %v28_v10 = vsel %vm27_vm1, %v939_v5, %v26_v9  ;;  %v108_v5 = vld [vmem:[%s1371_s1 + $0x138] sm:$0xff] }
  0x11   :  { %v1088_v9 = vld [vmem:[%s1371_s1 + $0xb8] sm:$0xff] }
  0x76   :  { %v18_v11 = vpop.xlane.xlu0 %17 }
  0x77   :  { %v1008_v12 = vmul.f32 %v28_v10, %v18_v11  ;;  %v1095_v11 = vld [vmem:[%s1371_s1 + $0xc0] sm:$0xff] }
  0x79   :  { %v31_v13 = vsub.f32 %v11_v0, %v1008_v12  ;;  %v112_v0 = vld [vmem:[%s1371_s1 + $0x158] sm:$0xff] }
  0x7b   :  { %v33_v14 = vmul.f32 %v31_v13, %v31_v13 }
  0x7d   :  { %v35_v15 = vsel %vm15_vm0, %v33_v14, 0.0  ;;  %v1102_v14 = vld [vmem:[%s1371_s1 + $0xc8] sm:$0xff] }
  0x7e   :  { %36 = vadd.xlane.f32.xlu1 %v35_v15  ;;  %v21_v16 = vpop.xlane.xlu0 %20 }
  0x7f   :  { %v1012_v17 = vmul.f32 %v28_v10, %v21_v16  ;;  %v1109_v16 = vld [vmem:[%s1371_s1 + $0xd0] sm:$0xff] }
  0x81   :  { %v32_v18 = vsub.f32 %v12_v2, %v1012_v17  ;;  %v111_v2 = vld [vmem:[%s1371_s1 + $0x150] sm:$0xff] }
  0x83   :  { %v34_v19 = vmul.f32 %v32_v18, %v32_v18 }
  0x85   :  { %v38_v20 = vsel %vm15_vm0, %v34_v19, 0.0  ;;  %v1116_v19 = vld [vmem:[%s1371_s1 + $0xd8] sm:$0xff] }
  0x86   :  { %39 = vadd.xlane.f32.xlu1 %v38_v20 }
  0x89   :  { %v146_v53 = vpop.f32.mrf.mxu2 }
  0x8a   :  { %v147_v61 = vadd.f32 %v146_v53, %v107_v58 }
  0x8c   :  { %v204_v4 = vmul.f32 %v147_v61, %v1071_v63  ;;  %v210_v22 = vmul.f32 %v147_v61, %v1123_v21 }
  0x91   :  { %v149_v54 = vpop.f32.mrf.mxu2 }
  0x92   :  { %v150_v8 = vadd.f32 %v149_v54, %v108_v5 }
  0x94   :  { %v205_v10 = vmul.f32 %v150_v8, %v1088_v9  ;;  %v207_v15 = vmul.f32 %v150_v8, %v1102_v14  ;;  %v209_v20 = vmul.f32 %v150_v8, %v1116_v19  ;;  %v211_v24 = vmul.f32 %v150_v8, %v1130_v23  ;;  %v102_v8 = vld [vmem:[%s1371_s1 + $0x108] sm:$0xff] }
  0xf1   :  { %v37_v29 = vpop.xlane.xlu1 %36 }
  0xf2   :  { %v41_v30 = vmul.f32 0.06666667, %v37_v29 }
  0xf4   :  { %v43_v31 = vadd.f32 1e-05, %v41_v30 }
  0xf6   :  { %940 = vrsqrt.f32 %v43_v31  ;;  %vm51_vm3 = vweird.f32 %v43_v31 }
  0xf9   :  { %v40_v32 = vpop.xlane.xlu1 %39 }
  0xfa   :  { %v42_v33 = vmul.f32 0.06666667, %v40_v32 }
  0xfc   :  { %v941_v34 = vpop.eup %940  ;;  %v44_v35 = vadd.f32 1e-05, %v42_v33 }
  0xfd   :  { %v46_v36 = vmul.f32 %v941_v34, %v43_v31  ;;  %vm52_vm2 = vweird.f32 %v941_v34 }
  0xfe   :  { %942 = vrsqrt.f32 %v44_v35  ;;  %vm53_vm4 = vmor %vm51_vm3, %vm52_vm2  ;;  %vm61_vm6 = vweird.f32 %v44_v35 }
  0xff   :  { %v47_v37 = vmul.f32 %v941_v34, %v46_v36 }
 0x101   :  { %v48_v38 = vmul.f32 0.5, %v47_v37 }
 0x103   :  { %v49_v39 = vsub.f32 1.5, %v48_v38 }
 0x104   :  { %v943_v40 = vpop.eup %942 }
 0x105   :  { %v56_v41 = vmul.f32 %v943_v40, %v44_v35  ;;  %v50_v42 = vmul.f32 %v941_v34, %v49_v39  ;;  %vm62_vm5 = vweird.f32 %v943_v40 }
 0x106   :  { %vm63_vm7 = vmor %vm61_vm6, %vm62_vm5 }
 0x107   :  { %v57_v43 = vmul.f32 %v943_v40, %v56_v41  ;;  %v54_v44 = vsel %vm53_vm4, %v941_v34, %v50_v42 }
 0x108   :  { %v1042_v45 = vmul.f32 %v54_v44, %v31_v13  ;;  %v1044_v46 = vmul.f32 %v54_v44, %v43_v31  ;;  %v206_v13 = vmul.f32 %v147_v61, %v1095_v11 }
 0x109   :  { %v58_v47 = vmul.f32 0.5, %v57_v43 }
 0x10a   :  { %901 = vmatmul.msk.f32.vlgmr.msra.gmra.mxu1 %vm15_vm0, %v1042_v45  ;;  %903 = vmatmul.msk.f32.vlgmr.msrb.gmra.mxu2 %vm15_vm0, %v1042_v45 }
 0x10b   :  { %v59_v48 = vsub.f32 1.5, %v58_v47 }
 0x10d   :  { %v60_v49 = vmul.f32 %v943_v40, %v59_v48  ;;  %v99_v48 = vld [vmem:[%s1371_s1 + $0xf0] sm:$0xff] }
 0x10f   :  { %v64_v50 = vsel %vm63_vm7, %v943_v40, %v60_v49 }
 0x110   :  { %v1050_v51 = vmul.f32 %v64_v50, %v32_v18  ;;  %v1052_v52 = vmul.f32 %v64_v50, %v44_v35  ;;  %v208_v18 = vmul.f32 %v147_v61, %v1109_v16 }
 0x112   :  { %902 = vmatmul.msk.f32.gmra.mxu1 %vm15_vm0, %v1050_v51  ;;  %904 = vmatmul.msk.f32.gmra.mxu2 %vm15_vm0, %v1050_v51 }
 0x187   :  { %v175_v55 = vpop.f32.mrf.mxu1 }
 0x188   :  { %v176_v1 = vadd.f32 %v175_v55, %v109_v62 }
 0x18d   :  { %v198_v56 = vpop.f32.mrf.mxu2 }
 0x18e   :  { %v199_v7 = vadd.f32 %v198_v56, %v111_v2 }
 0x18f   :  { %v178_v59 = vpop.f32.mrf.mxu1 }
 0x190   :  { %v179_v60 = vadd.f32 %v178_v59, %v110_v57  ;;  %v100_v57 = vld [vmem:[%s1371_s1 + $0xf8] sm:$0xff] }
 0x192   :  { %905 = vmatpush.xpose.msk.msra.mxu3 %vm15_vm0, %v179_v60 }
 0x195   :  { %v201_v3 = vpop.f32.mrf.mxu2 }
 0x196   :  { %906 = vmatpush.xpose.msk.msra.mxu3 %vm15_vm0, %v176_v1  ;;  %v202_v6 = vadd.f32 %v201_v3, %v112_v0  ;;  %v101_v1 = vld [vmem:[%s1371_s1 + $0x100] sm:$0xff] }
 0x198   :  { %521 = vmatpush.msra.mxu0 %v202_v6 }
 0x199   :  { %907 = vmatmul.msk.f32.vlgmr.msra.gmra.mxu3 %vm15_vm0, %v204_v4 }
 0x19a   :  { %522 = vmatpush.msra.mxu0 %v199_v7 }
 0x1a1   :  { %908 = vmatmul.msk.f32.gmra.mxu3 %vm15_vm0, %v205_v10 }
 0x1a9   :  { %909 = vmatmul.msk.f32.gmra.mxu3 %vm15_vm0, %v206_v13 }
 0x1b1   :  { %910 = vmatmul.msk.f32.gmra.mxu3 %vm15_vm0, %v207_v15 }
 0x1b9   :  { %911 = vmatmul.msk.f32.gmra.mxu3 %vm15_vm0, %v208_v18 }
 0x1c1   :  { %912 = vmatmul.msk.f32.gmra.mxu3 %vm15_vm0, %v209_v20 }
 0x1c9   :  { %913 = vmatmul.msk.f32.gmra.mxu3 %vm15_vm0, %v210_v22 }
 0x1d1   :  { %914 = vmatmul.msk.f32.gmra.mxu3 %vm15_vm0, %v211_v24  ;;  %v103_v24 = vld [vmem:[%s1371_s1 + $0x110] sm:$0xff] }
 0x21c   :  { %v259_v25 = vpop.f32.mrf.mxu3 }
 0x21d   :  { %v283_v26 = vsel %vm15_vm0, %v259_v25, -inf }
 0x21e   :  { %284 = vmax.xlane.f32.xlu2 %v283_v26 }
 0x224   :  { %v262_v27 = vpop.f32.mrf.mxu3 }
 0x225   :  { %v286_v28 = vsel %vm15_vm0, %v262_v27, -inf }
 0x226   :  { %287 = vmax.xlane.f32.xlu2 %v286_v28 }
 0x22c   :  { %v265_v29 = vpop.f32.mrf.mxu3 }
 0x22d   :  { %v289_v30 = vsel %vm15_vm0, %v265_v29, -inf }
 0x22e   :  { %290 = vmax.xlane.f32.xlu0 %v289_v30 }
 0x234   :  { %v268_v31 = vpop.f32.mrf.mxu3 }
 0x235   :  { %v292_v32 = vsel %vm15_vm0, %v268_v31, -inf }
 0x236   :  { %293 = vmax.xlane.f32.xlu1 %v292_v32 }
 0x23c   :  { %v271_v33 = vpop.f32.mrf.mxu3 }
 0x23d   :  { %v295_v34 = vsel %vm15_vm0, %v271_v33, -inf }
 0x23e   :  { %296 = vmax.xlane.f32.xlu2 %v295_v34 }
 0x244   :  { %v274_v35 = vpop.f32.mrf.mxu3 }
 0x245   :  { %v298_v36 = vsel %vm15_vm0, %v274_v35, -inf }
 0x246   :  { %299 = vmax.xlane.f32.xlu0 %v298_v36 }
 0x24c   :  { %v277_v37 = vpop.f32.mrf.mxu3 }
 0x24d   :  { %v301_v38 = vsel %vm15_vm0, %v277_v37, -inf }
 0x24e   :  { %302 = vmax.xlane.f32.xlu1 %v301_v38 }
 0x254   :  { %v1141_v39 = vpop.f32.mrf.mxu3 }
 0x255   :  { %v304_v40 = vsel %vm15_vm0, %v1141_v39, -inf }
 0x256   :  { %305 = vmax.xlane.f32.xlu0 %v304_v40 }
 0x291   :  { %v285_v41 = vpop.xlane.xlu2 %284 }
 0x292   :  { %v307_v42 = vsub.f32 %v259_v25, %v285_v41 }
 0x294   :  { %v315_v43 = vmul.f32 1.442695, %v307_v42 }
 0x296   :  { %944 = vpow2.f32 %v315_v43 }
 0x299   :  { %v288_v44 = vpop.xlane.xlu2 %287 }
 0x29a   :  { %v308_v47 = vsub.f32 %v262_v27, %v288_v44  ;;  %v106_v44 = vld [vmem:[%s1371_s1 + $0x128] sm:$0xff] }
 0x29c   :  { %v945_v49 = vpop.eup %944  ;;  %v317_v50 = vmul.f32 1.442695, %v308_v47 }
 0x29d   :  { %v1148_v53 = vmul.f32 %v945_v49, %v99_v48 }
 0x29e   :  { %946 = vpow2.f32 %v317_v50 }
 0x29f   :  { %v339_v54 = vsel %vm15_vm0, %v1148_v53, 0.0 }
 0x2a0   :  { %340 = vadd.xlane.f32.xlu2 %v339_v54 }
 0x2a1   :  { %v291_v55 = vpop.xlane.xlu0 %290 }
 0x2a2   :  { %v309_v56 = vsub.f32 %v265_v29, %v291_v55 }
 0x2a4   :  { %v947_v58 = vpop.eup %946  ;;  %v319_v59 = vmul.f32 1.442695, %v309_v56 }
 0x2a5   :  { %v1155_v60 = vmul.f32 %v947_v58, %v100_v57 }
 0x2a6   :  { %948 = vpow2.f32 %v319_v59 }
 0x2a7   :  { %v342_v61 = vsel %vm15_vm0, %v1155_v60, 0.0 }
 0x2a8   :  { %343 = vadd.xlane.f32.xlu1 %v342_v61 }
 0x2a9   :  { %v294_v62 = vpop.xlane.xlu1 %293 }
 0x2aa   :  { %v310_v0 = vsub.f32 %v268_v31, %v294_v62  ;;  %v104_v31 = vld [vmem:[%s1371_s1 + $0x118] sm:$0xff] }
 0x2ac   :  { %v949_v2 = vpop.eup %948  ;;  %v321_v3 = vmul.f32 1.442695, %v310_v0 }
 0x2ad   :  { %v1162_v4 = vmul.f32 %v949_v2, %v101_v1 }
 0x2ae   :  { %950 = vpow2.f32 %v321_v3 }
 0x2af   :  { %v345_v5 = vsel %vm15_vm0, %v1162_v4, 0.0 }
 0x2b0   :  { %346 = vadd.xlane.f32.xlu2 %v345_v5 }
 0x2b1   :  { %v297_v6 = vpop.xlane.xlu2 %296 }
 0x2b2   :  { %v311_v7 = vsub.f32 %v271_v33, %v297_v6 }
 0x2b4   :  { %v951_v10 = vpop.eup %950  ;;  %v323_v13 = vmul.f32 1.442695, %v311_v7 }
 0x2b5   :  { %v1169_v15 = vmul.f32 %v951_v10, %v102_v8 }
 0x2b6   :  { %952 = vpow2.f32 %v323_v13 }
 0x2b7   :  { %v348_v18 = vsel %vm15_vm0, %v1169_v15, 0.0 }
 0x2b8   :  { %349 = vadd.xlane.f32.xlu0 %v348_v18 }
 0x2b9   :  { %v300_v20 = vpop.xlane.xlu0 %299 }
 0x2ba   :  { %v312_v22 = vsub.f32 %v274_v35, %v300_v20 }
 0x2bc   :  { %v953_v25 = vpop.eup %952  ;;  %v325_v26 = vmul.f32 1.442695, %v312_v22 }
 0x2bd   :  { %v1176_v27 = vmul.f32 %v953_v25, %v103_v24 }
 0x2be   :  { %954 = vpow2.f32 %v325_v26 }
 0x2bf   :  { %v351_v28 = vsel %vm15_vm0, %v1176_v27, 0.0 }
 0x2c0   :  { %352 = vadd.xlane.f32.xlu1 %v351_v28 }
 0x2c1   :  { %v303_v29 = vpop.xlane.xlu1 %302 }
 0x2c2   :  { %v313_v30 = vsub.f32 %v277_v37, %v303_v29  ;;  %v105_v37 = vld [vmem:[%s1371_s1 + $0x120] sm:$0xff] }
 0x2c4   :  { %v955_v32 = vpop.eup %954  ;;  %v327_v33 = vmul.f32 1.442695, %v313_v30 }
 0x2c5   :  { %v1183_v34 = vmul.f32 %v955_v32, %v104_v31 }
 0x2c6   :  { %956 = vpow2.f32 %v327_v33 }
 0x2c7   :  { %v354_v35 = vsel %vm15_vm0, %v1183_v34, 0.0 }
 0x2c8   :  { %355 = vadd.xlane.f32.xlu2 %v354_v35 }
 0x2c9   :  { %v306_v36 = vpop.xlane.xlu0 %305 }
 0x2ca   :  { %v314_v38 = vsub.f32 %v1141_v39, %v306_v36 }
 0x2cc   :  { %v957_v40 = vpop.eup %956  ;;  %v329_v41 = vmul.f32 1.442695, %v314_v38 }
 0x2cd   :  { %v1191_v42 = vmul.f32 %v957_v40, %v105_v37 }
 0x2ce   :  { %958 = vpow2.f32 %v329_v41 }
 0x2cf   :  { %v357_v43 = vsel %vm15_vm0, %v1191_v42, 0.0 }
 0x2d0   :  { %358 = vadd.xlane.f32.xlu0 %v357_v43 }
 0x2d4   :  { %v959_v47 = vpop.eup %958 }
 0x2d5   :  { %v1198_v48 = vmul.f32 %v959_v47, %v106_v44 }
 0x2d7   :  { %v360_v39 = vsel %vm15_vm0, %v1198_v48, 0.0 }
 0x2d8   :  { %361 = vadd.xlane.f32.xlu1 %v360_v39 }
 0x313   :  { %v341_v49 = vpop.xlane.xlu2 %340 }
 0x314   :  { %960 = vrcp.f32 %v341_v49  ;;  %v374_v57 = vand.u32 2147483648, %v341_v49  ;;  %v372_v59 = vand.u32 2147483647, %v341_v49  ;;  %vm368_vm9 = vweird.f32 %v341_v49 }
 0x316   :  { %v375_v0 = vor.u32 1.1754944e-38, %v374_v57  ;;  %vm373_vm11 = vcmp.eq.f32.partialorder %v372_v59, 8.507059e+37 }
 0x31a   :  { %v961_v50 = vpop.eup %960 }
 0x31b   :  { %v364_v54 = vmul.f32 %v961_v50, %v341_v49  ;;  %v344_v55 = vpop.xlane.xlu1 %343  ;;  %vm369_vm8 = vweird.f32 %v961_v50 }
 0x31c   :  { %962 = vrcp.f32 %v344_v55  ;;  %vm370_vm10 = vmor %vm368_vm9, %vm369_vm8  ;;  %v388_v8 = vand.u32 2147483648, %v344_v55  ;;  %v386_v13 = vand.u32 2147483647, %v344_v55  ;;  %vm382_vm13 = vweird.f32 %v344_v55 }
 0x31d   :  { %v365_v56 = vsub.f32 1.0, %v364_v54 }
 0x31e   :  { %v389_v22 = vor.u32 1.1754944e-38, %v388_v8  ;;  %vm387_vm15 = vcmp.eq.f32.partialorder %v386_v13, 8.507059e+37 }
 0x31f   :  { %v366_v58 = vmul.f32 %v961_v50, %v365_v56 }
 0x321   :  { %v367_v61 = vadd.f32 %v961_v50, %v366_v58 }
 0x322   :  { %v963_v62 = vpop.eup %962 }
 0x323   :  { %v378_v1 = vmul.f32 %v963_v62, %v344_v55  ;;  %v347_v2 = vpop.xlane.xlu2 %346  ;;  %v371_v3 = vsel %vm370_vm10, %v961_v50, %v367_v61  ;;  %vm383_vm12 = vweird.f32 %v963_v62 }
 0x324   :  { %964 = vrcp.f32 %v347_v2  ;;  %v376_v5 = vsel %vm373_vm11, %v375_v0, %v371_v3  ;;  %vm384_vm14 = vmor %vm382_vm13, %vm383_vm12  ;;  %v402_v30 = vand.u32 2147483648, %v347_v2  ;;  %v400_v32 = vand.u32 2147483647, %v347_v2 }
 0x325   :  { %v379_v6 = vsub.f32 1.0, %v378_v1  ;;  %v475_v7 = vmul.f32 %v376_v5, %v1148_v53  ;;  %vm396_vm2 = vweird.f32 %v347_v2 }
 0x326   :  { %v403_v36 = vor.u32 1.1754944e-38, %v402_v30  ;;  %vm401_vm4 = vcmp.eq.f32.partialorder %v400_v32, 8.507059e+37 }
 0x327   :  { %v380_v10 = vmul.f32 %v963_v62, %v379_v6  ;;  %915 = vmatmul.msk.f32.vlgmr.msra.gmra.mxu0 %vm15_vm0, %v475_v7 }
 0x329   :  { %v381_v18 = vadd.f32 %v963_v62, %v380_v10 }
 0x32a   :  { %v965_v20 = vpop.eup %964 }
 0x32b   :  { %v392_v24 = vmul.f32 %v965_v20, %v347_v2  ;;  %v350_v25 = vpop.xlane.xlu0 %349  ;;  %v385_v26 = vsel %vm384_vm14, %v963_v62, %v381_v18  ;;  %vm397_vm1 = vweird.f32 %v965_v20 }
 0x32c   :  { %966 = vrcp.f32 %v350_v25  ;;  %v390_v28 = vsel %vm387_vm15, %v389_v22, %v385_v26  ;;  %vm398_vm3 = vmor %vm396_vm2, %vm397_vm1  ;;  %v416_v47 = vand.u32 2147483648, %v350_v25  ;;  %v414_v39 = vand.u32 2147483647, %v350_v25 }
 0x32d   :  { %v393_v29 = vsub.f32 1.0, %v392_v24  ;;  %v476_v53 = vmul.f32 %v390_v28, %v1155_v60  ;;  %vm410_vm6 = vweird.f32 %v350_v25 }
 0x32e   :  { %v417_v54 = vor.u32 1.1754944e-38, %v416_v47  ;;  %vm415_vm8 = vcmp.eq.f32.partialorder %v414_v39, 8.507059e+37 }
 0x32f   :  { %v394_v31 = vmul.f32 %v965_v20, %v393_v29  ;;  %916 = vmatmul.msk.f32.gmra.mxu0 %vm15_vm0, %v476_v53 }
 0x331   :  { %v395_v33 = vadd.f32 %v965_v20, %v394_v31 }
 0x332   :  { %v967_v35 = vpop.eup %966 }
 0x333   :  { %v406_v38 = vmul.f32 %v967_v35, %v350_v25  ;;  %v353_v37 = vpop.xlane.xlu1 %352  ;;  %v399_v40 = vsel %vm398_vm3, %v965_v20, %v395_v33  ;;  %vm411_vm5 = vweird.f32 %v967_v35 }
 0x334   :  { %968 = vrcp.f32 %v353_v37  ;;  %v404_v41 = vsel %vm401_vm4, %v403_v36, %v399_v40  ;;  %vm412_vm7 = vmor %vm410_vm6, %vm411_vm5  ;;  %v430_v62 = vand.u32 2147483648, %v353_v37  ;;  %v428_v0 = vand.u32 2147483647, %v353_v37 }
 0x335   :  { %v407_v43 = vsub.f32 1.0, %v406_v38  ;;  %v477_v60 = vmul.f32 %v404_v41, %v1162_v4  ;;  %vm424_vm10 = vweird.f32 %v353_v37 }
 0x336   :  { %v431_v3 = vor.u32 1.1754944e-38, %v430_v62  ;;  %vm429_vm12 = vcmp.eq.f32.partialorder %v428_v0, 8.507059e+37 }
 0x337   :  { %v408_v44 = vmul.f32 %v967_v35, %v407_v43  ;;  %917 = vmatmul.msk.f32.gmra.mxu0 %vm15_vm0, %v477_v60 }
 0x339   :  { %v409_v49 = vadd.f32 %v967_v35, %v408_v44 }
 0x33a   :  { %v969_v50 = vpop.eup %968 }
 0x33b   :  { %v420_v55 = vmul.f32 %v969_v50, %v353_v37  ;;  %v356_v56 = vpop.xlane.xlu2 %355  ;;  %v413_v57 = vsel %vm412_vm7, %v967_v35, %v409_v49  ;;  %vm425_vm9 = vweird.f32 %v969_v50 }
 0x33c   :  { %970 = vrcp.f32 %v356_v56  ;;  %v418_v59 = vsel %vm415_vm8, %v417_v54, %v413_v57  ;;  %vm426_vm11 = vmor %vm424_vm10, %vm425_vm9  ;;  %v444_v18 = vand.u32 2147483648, %v356_v56  ;;  %v442_v20 = vand.u32 2147483647, %v356_v56 }
 0x33d   :  { %v421_v58 = vsub.f32 1.0, %v420_v55  ;;  %v478_v4 = vmul.f32 %v418_v59, %v1169_v15  ;;  %vm438_vm14 = vweird.f32 %v356_v56  ;;  %vm622_vm10 = vcmask 261120  }
 0x33e   :  { %v445_v25 = vor.u32 1.1754944e-38, %v444_v18  ;;  %vm443_vm1 = vcmp.eq.f32.partialorder %v442_v20, 8.507059e+37 }
 0x33f   :  { %v422_v61 = vmul.f32 %v969_v50, %v421_v58  ;;  %918 = vmatmul.msk.f32.gmra.mxu0 %vm15_vm0, %v478_v4  ;;  %v75_v58 = vld [vmem:[%s1371_s1 + $0x30] sm:$0xff] }
 0x341   :  { %v423_v1 = vadd.f32 %v969_v50, %v422_v61  ;;  %v77_v61 = vld [vmem:[%s1371_s1 + $0x40] sm:$0xff] }
 0x342   :  { %v971_v2 = vpop.eup %970 }
 0x343   :  { %v434_v5 = vmul.f32 %v971_v2, %v356_v56  ;;  %v359_v6 = vpop.xlane.xlu0 %358  ;;  %v427_v7 = vsel %vm426_vm11, %v969_v50, %v423_v1  ;;  %vm439_vm13 = vweird.f32 %v971_v2 }
 0x344   :  { %972 = vrcp.f32 %v359_v6  ;;  %v432_v10 = vsel %vm429_vm12, %v431_v3, %v427_v7  ;;  %vm440_vm15 = vmor %vm438_vm14, %vm439_vm13  ;;  %v458_v31 = vand.u32 2147483648, %v359_v6  ;;  %v456_v33 = vand.u32 2147483647, %v359_v6 }
 0x345   :  { %v435_v8 = vsub.f32 1.0, %v434_v5  ;;  %v479_v15 = vmul.f32 %v432_v10, %v1176_v27  ;;  %vm452_vm3 = vweird.f32 %v359_v6 }
 0x346   :  { %v459_v38 = vor.u32 1.1754944e-38, %v458_v31  ;;  %vm457_vm5 = vcmp.eq.f32.partialorder %v456_v33, 8.507059e+37  ;;  %v115_v31 = vld [vmem:[%s1371_s1 + $0x170] sm:$0xff] }
 0x347   :  { %v436_v13 = vmul.f32 %v971_v2, %v435_v8  ;;  %919 = vmatmul.msk.f32.gmra.mxu0 %vm15_vm0, %v479_v15 }
 0x349   :  { %v437_v22 = vadd.f32 %v971_v2, %v436_v13 }
 0x34a   :  { %v973_v24 = vpop.eup %972 }
 0x34b   :  { %v448_v26 = vmul.f32 %v973_v24, %v359_v6  ;;  %v362_v28 = vpop.xlane.xlu1 %361  ;;  %v441_v29 = vsel %vm440_vm15, %v971_v2, %v437_v22  ;;  %vm453_vm2 = vweird.f32 %v973_v24 }
 0x34c   :  { %974 = vrcp.f32 %v362_v28  ;;  %v446_v30 = vsel %vm443_vm1, %v445_v25, %v441_v29  ;;  %vm454_vm4 = vmor %vm452_vm3, %vm453_vm2  ;;  %v472_v44 = vand.u32 2147483648, %v362_v28  ;;  %vm466_vm7 = vweird.f32 %v362_v28 }
 0x34d   :  { %v449_v53 = vsub.f32 1.0, %v448_v26  ;;  %v480_v27 = vmul.f32 %v446_v30, %v1183_v34  ;;  %v470_v34 = vand.u32 2147483647, %v362_v28 }
 0x34e   :  { %v473_v49 = vor.u32 1.1754944e-38, %v472_v44 }
 0x34f   :  { %v450_v32 = vmul.f32 %v973_v24, %v449_v53  ;;  %920 = vmatmul.msk.f32.gmra.mxu0 %vm15_vm0, %v480_v27  ;;  %vm471_vm9 = vcmp.eq.f32.partialorder %v470_v34, 8.507059e+37 }
 0x351   :  { %v451_v35 = vadd.f32 %v973_v24, %v450_v32 }
 0x352   :  { %v975_v36 = vpop.eup %974 }
 0x353   :  { %v462_v37 = vmul.f32 %v975_v36, %v362_v28  ;;  %v455_v40 = vsel %vm454_vm4, %v973_v24, %v451_v35  ;;  %vm467_vm6 = vweird.f32 %v975_v36  ;;  %v114_v28 = vld [vmem:[%s1371_s1 + $0x168] sm:$0xff] }
 0x354   :  { %v460_v41 = vsel %vm457_vm5, %v459_v38, %v455_v40  ;;  %vm468_vm8 = vmor %vm466_vm7, %vm467_vm6 }
 0x355   :  { %v463_v43 = vsub.f32 1.0, %v462_v37  ;;  %v481_v60 = vmul.f32 %v460_v41, %v1191_v42  ;;  %v76_v42 = vld [vmem:[%s1371_s1 + $0x38] sm:$0xff]  ;;  %v118_v41 = vld [vmem:[%s1371_s1 + $0x188] sm:$0xff] }
 0x356   :  { %582 = vmatpush.msrb.mxu1 %v76_v42 }
 0x357   :  { %v464_v47 = vmul.f32 %v975_v36, %v463_v43  ;;  %921 = vmatmul.msk.f32.gmra.mxu0 %vm15_vm0, %v481_v60 }
 0x358   :  { %583 = vmatpush.msrb.mxu1 %v75_v58 }
 0x359   :  { %v465_v39 = vadd.f32 %v975_v36, %v464_v47 }
 0x35b   :  { %v469_v50 = vsel %vm468_vm8, %v975_v36, %v465_v39 }
 0x35c   :  { %v474_v54 = vsel %vm471_vm9, %v473_v49, %v469_v50 }
 0x35d   :  { %v482_v55 = vmul.f32 %v474_v54, %v1198_v48  ;;  %v78_v48 = vld [vmem:[%s1371_s1 + $0x48] sm:$0xff] }
 0x35e   :  { %613 = vmatpush.msra.mxu2 %v78_v48 }
 0x35f   :  { %922 = vmatmul.msk.f32.gmra.mxu0 %vm15_vm0, %v482_v55 }
 0x360   :  { %614 = vmatpush.msra.mxu2 %v77_v61 }
 0x3a4   :  { %v524_v56 = vpop.f32.mrf.mxu0 }
 0x3a5   :  { %v548_v2 = vmul.f32 %v524_v56, %v1071_v63 }
 0x3ac   :  { %v527_v57 = vpop.f32.mrf.mxu0 }
 0x3ad   :  { %v549_v13 = vmul.f32 %v527_v57, %v1088_v9  ;;  %v81_v9 = vld [vmem:[%s1371_s1 + $0x60] sm:$0xff] }
 0x3b4   :  { %v530_v59 = vpop.f32.mrf.mxu0 }
 0x3b5   :  { %v550_v1 = vmul.f32 %v530_v59, %v1095_v11  ;;  %v86_v59 = vld [vmem:[%s1371_s1 + $0x88] sm:$0xff] }
 0x3b6   :  { %758 = vmatpush.msrb.mxu2 %v86_v59 }
 0x3b7   :  { %v556_v5 = vadd.f32 %v550_v1, %v548_v2 }
 0x3bc   :  { %v533_v4 = vpop.f32.mrf.mxu0 }
 0x3bd   :  { %v551_v10 = vmul.f32 %v533_v4, %v1102_v14  ;;  %v80_v14 = vld [vmem:[%s1371_s1 + $0x58] sm:$0xff] }
 0x3bf   :  { %v557_v20 = vadd.f32 %v551_v10, %v549_v13  ;;  %v83_v10 = vld [vmem:[%s1371_s1 + $0x70] sm:$0xff] }
 0x3c4   :  { %v536_v62 = vpop.f32.mrf.mxu0 }
 0x3c5   :  { %v552_v3 = vmul.f32 %v536_v62, %v1109_v16  ;;  %v85_v62 = vld [vmem:[%s1371_s1 + $0x80] sm:$0xff] }
 0x3c6   :  { %759 = vmatpush.msrb.mxu2 %v85_v62 }
 0x3c7   :  { %v558_v7 = vadd.f32 %v556_v5, %v552_v3  ;;  %v84_v5 = vld [vmem:[%s1371_s1 + $0x78] sm:$0xff] }
 0x3c8   :  { %760 = vmatpush.msrb.mxu2 %v84_v5 }
 0x3ca   :  { %761 = vmatpush.msrb.mxu2 %v83_v10 }
 0x3cc   :  { %v539_v0 = vpop.f32.mrf.mxu0 }
 0x3cd   :  { %v553_v18 = vmul.f32 %v539_v0, %v1116_v19  ;;  %v79_v19 = vld [vmem:[%s1371_s1 + $0x50] sm:$0xff] }
 0x3cf   :  { %v559_v22 = vadd.f32 %v557_v20, %v553_v18 }
 0x3d4   :  { %v542_v6 = vpop.f32.mrf.mxu0 }
 0x3d5   :  { %v554_v8 = vmul.f32 %v542_v6, %v1123_v21  ;;  %v82_v21 = vld [vmem:[%s1371_s1 + $0x68] sm:$0xff] }
 0x3d6   :  { %641 = vmatpush.msra.mxu1 %v82_v21 }
 0x3d7   :  { %v560_v15 = vadd.f32 %v558_v7, %v554_v8 }
 0x3d8   :  { %642 = vmatpush.msra.mxu1 %v81_v9 }
 0x3d9   :  { %923 = vmatmul.msk.f32.vlgmr.msrb.gmra.mxu1 %vm15_vm0, %v560_v15 }
 0x3da   :  { %643 = vmatpush.msra.mxu1 %v80_v14 }
 0x3dc   :  { %v545_v11 = vpop.f32.mrf.mxu0  ;;  %644 = vmatpush.msra.mxu1 %v79_v19 }
 0x3dd   :  { %v555_v63 = vmul.f32 %v545_v11, %v1130_v23  ;;  %v113_v23 = vld [vmem:[%s1371_s1 + $0x160] sm:$0xff] }
 0x3df   :  { %v561_v16 = vadd.f32 %v559_v22, %v555_v63 }
 0x3e1   :  { %924 = vmatmul.msk.f32.gmra.mxu1 %vm15_vm0, %v561_v16 }
 0x456   :  { %v585_v24 = vpop.f32.mrf.mxu1 }
 0x457   :  { %v586_v25 = vadd.f32 %v585_v24, %v113_v23 }
 0x459   :  { %v591_v26 = vadd.f32 %v586_v25, %v1042_v45  ;;  %v116_v45 = vld [vmem:[%s1371_s1 + $0x178] sm:$0xff] }
 0x45b   :  { %925 = vmatmul.msk.f32.vlgmr.msra.gmra.mxu2 %vm15_vm0, %v591_v26 }
 0x45e   :  { %v588_v29 = vpop.f32.mrf.mxu1 }
 0x45f   :  { %v589_v53 = vadd.f32 %v588_v29, %v114_v28 }
 0x461   :  { %v592_v30 = vadd.f32 %v589_v53, %v1050_v51  ;;  %v117_v51 = vld [vmem:[%s1371_s1 + $0x180] sm:$0xff] }
 0x463   :  { %926 = vmatmul.msk.f32.gmra.mxu2 %vm15_vm0, %v592_v30 }
 0x4de   :  { %v616_v27 = vpop.f32.mrf.mxu2 }
 0x4df   :  { %v1265_v32 = vadd.f32 %v616_v27, %v115_v31 }
 0x4e1   :  { %927 = vmatmul.msk.f32.vlgmr.msra.gmra.mxu1 %vm622_vm10, %v1265_v32 }
 0x4e6   :  { %v619_v33 = vpop.f32.mrf.mxu2 }
 0x4e7   :  { %v1272_v35 = vadd.f32 %v619_v33, %v116_v45 }
 0x4e9   :  { %928 = vmatmul.msk.f32.gmra.mxu1 %vm622_vm10, %v1272_v35 }
 0x55e   :  { %v646_v36 = vpop.f32.mrf.mxu1 }
 0x55f   :  { %v1279_v38 = vadd.f32 %v646_v36, %v117_v51 }
 0x561   :  { %v1282_v37 = vmul.f32 0.70710677, %v1279_v38 }
 0x563   :  { %v656_v40 = vmul.f32 %v1282_v37, %v1282_v37 }
 0x565   :  { %v657_v43 = vmin.f32 %v656_v40, 16.0 }
 0x566   :  { %v649_v60 = vpop.f32.mrf.mxu1 }
 0x567   :  { %v658_v44 = vmul.f32 2.1237322e-06, %v657_v43  ;;  %v669_v47 = vmul.f32 3.8918573e-05, %v657_v43  ;;  %v1289_v34 = vadd.f32 %v649_v60, %v118_v41 }
 0x569   :  { %v659_v39 = vadd.f32 0.00028619796, %v658_v44  ;;  %v670_v49 = vadd.f32 0.001143296, %v669_v47  ;;  %v1292_v50 = vmul.f32 0.70710677, %v1289_v34 }
 0x56b   :  { %v660_v54 = vmul.f32 %v659_v39, %v657_v43  ;;  %v671_v55 = vmul.f32 %v670_v49, %v657_v43  ;;  %v696_v56 = vmul.f32 %v1292_v50, %v1292_v50 }
 0x56d   :  { %v672_v42 = vadd.f32 0.014752088, %v671_v55  ;;  %v661_v57 = vadd.f32 0.0036580483, %v660_v54  ;;  %v697_v58 = vmin.f32 %v696_v56, 16.0 }
 0x56f   :  { %v673_v4 = vmul.f32 %v672_v42, %v657_v43  ;;  %v698_v48 = vmul.f32 2.1237322e-06, %v697_v58  ;;  %v709_v61 = vmul.f32 3.8918573e-05, %v697_v58  ;;  %v662_v1 = vmul.f32 %v661_v57, %v657_v43 }
 0x571   :  { %v674_v0 = vadd.f32 0.112945676, %v673_v4  ;;  %v699_v2 = vadd.f32 0.00028619796, %v698_v48  ;;  %v710_v3 = vadd.f32 0.001143296, %v709_v61 }
 0x572   :  { %v663_v13 = vadd.f32 0.05243302, %v662_v1  ;;  %v652_v48 = vmul.f32 0.5, %v1279_v38  ;;  %v119_v38 = vld [vmem:[%s1371_s1 + $0x190] sm:$0xff] }
 0x573   :  { %v675_v6 = vmul.f32 %v674_v0, %v657_v43  ;;  %v700_v7 = vmul.f32 %v699_v2, %v697_v58  ;;  %v711_v8 = vmul.f32 %v710_v3, %v697_v58 }
 0x574   :  { %v664_v16 = vmul.f32 %v663_v13, %v657_v43 }
 0x575   :  { %v676_v15 = vadd.f32 0.4994258, %v675_v6  ;;  %v712_v18 = vadd.f32 0.014752088, %v711_v8  ;;  %v701_v11 = vadd.f32 0.0036580483, %v700_v7 }
 0x576   :  { %v665_v19 = vadd.f32 0.18741608, %v664_v16  ;;  %v653_v6 = vmul.f32 0.5, %v1289_v34  ;;  %v120_v34 = vld [vmem:[%s1371_s1 + $0x198] sm:$0xff] }
 0x577   :  { %v677_v20 = vmul.f32 %v676_v15, %v657_v43  ;;  %v713_v22 = vmul.f32 %v712_v18, %v697_v58  ;;  %v702_v9 = vmul.f32 %v701_v11, %v697_v58 }
 0x578   :  { %v666_v28 = vmul.f32 %v665_v19, %v657_v43 }
 0x579   :  { %v678_v63 = vadd.f32 1.0, %v677_v20  ;;  %v714_v21 = vadd.f32 0.112945676, %v713_v22  ;;  %v703_v24 = vadd.f32 0.05243302, %v702_v9 }
 0x57a   :  { %v667_v45 = vadd.f32 1.1283791, %v666_v28 }
 0x57b   :  { %976 = vrcp.f32 %v678_v63  ;;  %v715_v14 = vmul.f32 %v714_v21, %v697_v58  ;;  %v704_v30 = vmul.f32 %v703_v24, %v697_v58  ;;  %v690_v27 = vand.u32 2147483648, %v678_v63 }
 0x57c   :  { %v688_v51 = vand.u32 2147483647, %v678_v63  ;;  %vm684_vm11 = vweird.f32 %v678_v63  ;;  %v668_v44 = vmul.f32 %v667_v45, %v1282_v37 }
 0x57d   :  { %v716_v23 = vadd.f32 0.4994258, %v715_v14  ;;  %v705_v36 = vadd.f32 0.18741608, %v704_v30  ;;  %v691_v41 = vor.u32 1.1754944e-38, %v690_v27  ;;  %v90_v30 = vld [vmem:[%s1371_s1 + $0xa8] sm:$0xff] }
 0x57e   :  { %vm689_vm13 = vcmp.eq.f32.partialorder %v688_v51, 8.507059e+37  ;;  %877 = vmatpush.msrb.mxu1 %v90_v30  ;;  %v89_v51 = vld [vmem:[%s1371_s1 + $0xa0] sm:$0xff] }
 0x57f   :  { %v717_v25 = vmul.f32 %v716_v23, %v697_v58  ;;  %v706_v39 = vmul.f32 %v705_v36, %v697_v58 }
 0x580   :  { %878 = vmatpush.msrb.mxu1 %v89_v51 }
 0x581   :  { %v977_v26 = vpop.eup %976  ;;  %v718_v53 = vadd.f32 1.0, %v717_v25  ;;  %v707_v57 = vadd.f32 1.1283791, %v706_v39  ;;  %v87_v39 = vld [vmem:[%s1371_s1 + $0x90] sm:$0xff] }
 0x582   :  { %v680_v29 = vmul.f32 %v977_v26, %v678_v63  ;;  %vm685_vm0 = vweird.f32 %v977_v26 }
 0x583   :  { %978 = vrcp.f32 %v718_v53  ;;  %vm686_vm12 = vmor %vm684_vm11, %vm685_vm0  ;;  %v730_v42 = vand.u32 2147483648, %v718_v53  ;;  %v728_v4 = vand.u32 2147483647, %v718_v53  ;;  %vm724_vm15 = vweird.f32 %v718_v53 }
 0x584   :  { %v681_v31 = vsub.f32 1.0, %v680_v29  ;;  %v708_v1 = vmul.f32 %v707_v57, %v1292_v50  ;;  %vm892_vm11 = vcmask 64512  }
 0x585   :  { %v731_v37 = vor.u32 1.1754944e-38, %v730_v42  ;;  %vm729_vm2 = vcmp.eq.f32.partialorder %v728_v4, 8.507059e+37 }
 0x586   :  { %v682_v33 = vmul.f32 %v977_v26, %v681_v31 }
 0x588   :  { %v683_v40 = vadd.f32 %v977_v26, %v682_v33 }
 0x589   :  { %v979_v60 = vpop.eup %978 }
 0x58a   :  { %v687_v47 = vsel %vm686_vm12, %v977_v26, %v683_v40  ;;  %v720_v49 = vmul.f32 %v979_v60, %v718_v53  ;;  %vm725_vm14 = vweird.f32 %v979_v60 }
 0x58b   :  { %v692_v43 = vsel %vm689_vm13, %v691_v41, %v687_v47  ;;  %vm726_vm1 = vmor %vm724_vm15, %vm725_vm14 }
 0x58c   :  { %v693_v54 = vmul.f32 %v692_v43, %v668_v44  ;;  %v721_v55 = vsub.f32 1.0, %v720_v49 }
 0x58e   :  { %v929_v56 = vclamps-f32 %v693_v54, 1.0  ;;  %v722_v59 = vmul.f32 %v979_v60, %v721_v55 }
 0x590   :  { %v736_v61 = vadd.f32 1.0, %v929_v56  ;;  %v723_v62 = vadd.f32 %v979_v60, %v722_v59 }
 0x592   :  { %v738_v0 = vmul.f32 %v736_v61, %v652_v48  ;;  %v727_v58 = vsel %vm726_vm1, %v979_v60, %v723_v62  ;;  %v88_v60 = vld [vmem:[%s1371_s1 + $0x98] sm:$0xff] }
 0x593   :  { %v732_v2 = vsel %vm729_vm2, %v731_v37, %v727_v58  ;;  %879 = vmatpush.msrb.mxu1 %v88_v60 }
 0x594   :  { %931 = vmatmul.msk.f32.vlgmr.msrb.gmra.mxu2 %vm622_vm10, %v738_v0  ;;  %v733_v3 = vmul.f32 %v732_v2, %v708_v1 }
 0x595   :  { %880 = vmatpush.msrb.mxu1 %v87_v39 }
 0x596   :  { %v930_v5 = vclamps-f32 %v733_v3, 1.0 }
 0x598   :  { %v737_v7 = vadd.f32 1.0, %v930_v5 }
 0x59a   :  { %v739_v8 = vmul.f32 %v737_v7, %v653_v6 }
 0x59c   :  { %932 = vmatmul.msk.f32.gmra.mxu2 %vm622_vm10, %v739_v8 }
 0x617   :  { %v763_v10 = vpop.f32.mrf.mxu2 }
 0x618   :  { %v1317_v15 = vadd.f32 %v763_v10, %v119_v38 }
 0x61a   :  { %v1320_v50 = vmul.f32 0.70710677, %v1317_v15 }
 0x61c   :  { %v773_v13 = vmul.f32 %v1320_v50, %v1320_v50 }
 0x61e   :  { %v774_v18 = vmin.f32 %v773_v13, 16.0 }
 0x61f   :  { %v766_v22 = vpop.f32.mrf.mxu2 }
 0x620   :  { %v775_v20 = vmul.f32 2.1237322e-06, %v774_v18  ;;  %v786_v11 = vmul.f32 3.8918573e-05, %v774_v18  ;;  %v1327_v63 = vadd.f32 %v766_v22, %v120_v34 }
 0x622   :  { %v776_v16 = vadd.f32 0.00028619796, %v775_v20  ;;  %v787_v21 = vadd.f32 0.001143296, %v786_v11  ;;  %v1330_v9 = vmul.f32 0.70710677, %v1327_v63 }
 0x624   :  { %v777_v14 = vmul.f32 %v776_v16, %v774_v18  ;;  %v788_v19 = vmul.f32 %v787_v21, %v774_v18  ;;  %v813_v23 = vmul.f32 %v1330_v9, %v1330_v9 }
 0x626   :  { %v789_v24 = vadd.f32 0.014752088, %v788_v19  ;;  %v778_v25 = vadd.f32 0.0036580483, %v777_v14  ;;  %v814_v26 = vmin.f32 %v813_v23, 16.0 }
 0x628   :  { %v790_v28 = vmul.f32 %v789_v24, %v774_v18  ;;  %v815_v29 = vmul.f32 2.1237322e-06, %v814_v26  ;;  %v826_v53 = vmul.f32 3.8918573e-05, %v814_v26  ;;  %v779_v27 = vmul.f32 %v778_v25, %v774_v18 }
 0x62a   :  { %v791_v31 = vadd.f32 0.112945676, %v790_v28  ;;  %v816_v45 = vadd.f32 0.00028619796, %v815_v29  ;;  %v827_v33 = vadd.f32 0.001143296, %v826_v53 }
 0x62b   :  { %v780_v47 = vadd.f32 0.05243302, %v779_v27  ;;  %v769_v53 = vmul.f32 0.5, %v1317_v15 }
 0x62c   :  { %v792_v36 = vmul.f32 %v791_v31, %v774_v18  ;;  %v817_v40 = vmul.f32 %v816_v45, %v814_v26  ;;  %v828_v41 = vmul.f32 %v827_v33, %v814_v26 }
 0x62d   :  { %v781_v42 = vmul.f32 %v780_v47, %v774_v18 }
 0x62e   :  { %v793_v44 = vadd.f32 0.4994258, %v792_v36  ;;  %v829_v43 = vadd.f32 0.014752088, %v828_v41  ;;  %v818_v54 = vadd.f32 0.0036580483, %v817_v40 }
 0x62f   :  { %v782_v48 = vadd.f32 0.18741608, %v781_v42  ;;  %v770_v41 = vmul.f32 0.5, %v1327_v63 }
 0x630   :  { %v794_v49 = vmul.f32 %v793_v44, %v774_v18  ;;  %v830_v55 = vmul.f32 %v829_v43, %v814_v26  ;;  %v819_v59 = vmul.f32 %v818_v54, %v814_v26 }
 0x631   :  { %v783_v1 = vmul.f32 %v782_v48, %v774_v18 }
 0x632   :  { %v795_v56 = vadd.f32 1.0, %v794_v49  ;;  %v831_v57 = vadd.f32 0.112945676, %v830_v55  ;;  %v820_v62 = vadd.f32 0.05243302, %v819_v59 }
 0x633   :  { %v784_v7 = vadd.f32 1.1283791, %v783_v1 }
 0x634   :  { %980 = vrcp.f32 %v795_v56  ;;  %v832_v4 = vmul.f32 %v831_v57, %v814_v26  ;;  %v821_v3 = vmul.f32 %v820_v62, %v814_v26  ;;  %v807_v6 = vand.u32 2147483648, %v795_v56 }
 0x635   :  { %v805_v38 = vand.u32 2147483647, %v795_v56  ;;  %vm801_vm4 = vweird.f32 %v795_v56  ;;  %v785_v11 = vmul.f32 %v784_v7, %v1320_v50 }
 0x636   :  { %v833_v61 = vadd.f32 0.4994258, %v832_v4  ;;  %v822_v10 = vadd.f32 0.18741608, %v821_v3  ;;  %v808_v34 = vor.u32 1.1754944e-38, %v807_v6 }
 0x637   :  { %vm806_vm6 = vcmp.eq.f32.partialorder %v805_v38, 8.507059e+37 }
 0x638   :  { %v834_v0 = vmul.f32 %v833_v61, %v814_v26  ;;  %v823_v16 = vmul.f32 %v822_v10, %v814_v26 }
 0x63a   :  { %v981_v37 = vpop.eup %980  ;;  %v835_v2 = vadd.f32 1.0, %v834_v0  ;;  %v824_v25 = vadd.f32 1.1283791, %v823_v16 }
 0x63b   :  { %v797_v58 = vmul.f32 %v981_v37, %v795_v56  ;;  %vm802_vm3 = vweird.f32 %v981_v37 }
 0x63c   :  { %982 = vrcp.f32 %v835_v2  ;;  %vm803_vm5 = vmor %vm801_vm4, %vm802_vm3  ;;  %v847_v24 = vand.u32 2147483648, %v835_v2  ;;  %v845_v29 = vand.u32 2147483647, %v835_v2  ;;  %vm841_vm8 = vweird.f32 %v835_v2 }
 0x63d   :  { %v798_v5 = vsub.f32 1.0, %v797_v58  ;;  %v825_v45 = vmul.f32 %v824_v25, %v1330_v9  ;;  %v121_v9 = vld [vmem:[%s1371_s1 + $0x1a0] sm:$0xff] }
 0x63e   :  { %v848_v50 = vor.u32 1.1754944e-38, %v847_v24  ;;  %vm846_vm0 = vcmp.eq.f32.partialorder %v845_v29, 8.507059e+37 }
 0x63f   :  { %v799_v8 = vmul.f32 %v981_v37, %v798_v5 }
 0x641   :  { %v800_v13 = vadd.f32 %v981_v37, %v799_v8 }
 0x642   :  { %v983_v20 = vpop.eup %982 }
 0x643   :  { %v804_v22 = vsel %vm803_vm5, %v981_v37, %v800_v13  ;;  %v837_v21 = vmul.f32 %v983_v20, %v835_v2  ;;  %vm842_vm7 = vweird.f32 %v983_v20 }
 0x644   :  { %v809_v18 = vsel %vm806_vm6, %v808_v34, %v804_v22  ;;  %vm843_vm9 = vmor %vm841_vm8, %vm842_vm7 }
 0x645   :  { %v810_v14 = vmul.f32 %v809_v18, %v785_v11  ;;  %v838_v19 = vsub.f32 1.0, %v837_v21 }
 0x647   :  { %v933_v23 = vclamps-f32 %v810_v14, 1.0  ;;  %v839_v28 = vmul.f32 %v983_v20, %v838_v19 }
 0x649   :  { %v853_v30 = vadd.f32 1.0, %v933_v23  ;;  %v840_v31 = vadd.f32 %v983_v20, %v839_v28 }
 0x64b   :  { %v855_v27 = vmul.f32 %v853_v30, %v769_v53  ;;  %v844_v26 = vsel %vm843_vm9, %v983_v20, %v840_v31 }
 0x64c   :  { %v849_v51 = vsel %vm846_vm0, %v848_v50, %v844_v26 }
 0x64d   :  { %v857_v33 = vadd.f32 %v855_v27, %v1265_v32  ;;  %v850_v36 = vmul.f32 %v849_v51, %v825_v45 }
 0x64f   :  { %935 = vmatmul.msk.f32.vlgmr.msrb.gmra.mxu1 %vm622_vm10, %v857_v33  ;;  %v934_v40 = vclamps-f32 %v850_v36, 1.0 }
 0x651   :  { %v854_v15 = vadd.f32 1.0, %v934_v40 }
 0x653   :  { %v856_v60 = vmul.f32 %v854_v15, %v770_v41 }
 0x655   :  { %v858_v44 = vadd.f32 %v856_v60, %v1272_v35  ;;  %v122_v35 = vld [vmem:[%s1371_s1 + $0x1a8] sm:$0xff] }
 0x657   :  { %936 = vmatmul.msk.f32.gmra.mxu1 %vm622_vm10, %v858_v44 }
 0x6cc   :  { %v882_v47 = vpop.f32.mrf.mxu1 }
 0x6cd   :  { %v883_v43 = vadd.f32 %v882_v47, %v121_v9 }
 0x6cf   :  { %v888_v32 = vmul.f32 %v883_v43, %v1044_v46 }
 0x6d1   :  { %v890_v39 = vadd.f32 %v888_v32, %v1008_v12 }
 0x6d3   :  { %893 = vst.msk [vmem:[%s1372_s2] sm:$0xff] %vm892_vm11, %v890_v39 }
 0x6d4   :  { %v885_v63 = vpop.f32.mrf.mxu1 }
 0x6d5   :  { %v886_v49 = vadd.f32 %v885_v63, %v122_v35 }
 0x6d7   :  { %v889_v54 = vmul.f32 %v886_v49, %v1052_v52 }
 0x6d9   :  { %v891_v55 = vadd.f32 %v889_v54, %v1012_v17 }
 0x6db   :  { %894 = vst.msk [vmem:[%s1372_s2 + $0x8] sm:$0xff] %vm892_vm11, %v891_v55 }

</bundles_post_ra>
